<compile_context>
chip_gen: v5e
topology: v5e:2x2
jax: 0.10.0
libtpu: 0.0.40
codegen_flags: <defaults>
</compile_context>

<pallas_src>
import jax
import jax.numpy as jnp
from jax.experimental import pallas as pl
from jax.experimental.pallas import tpu as pltpu

_TARGET_BLOCK_BYTES = 2 << 20   # ~2 MiB input block: >=85% of HBM roofline,
                                # comfortable inside v7x's 64 MiB VMEM.
_MIN_GRID_STEPS = 4             # >=2 pipelined steps per TC on v7x megacore.
_HALO_ROWS = 8                  # sublane-aligned halo block (only 2 rows used)


def _sobel_block(x, out_rows, wo):
    """Separable Sobel magnitude on one tile.

    x: (tb, rows, W) with rows >= out_rows + 2.  Returns (tb, out_rows, wo).
    """
    # Horizontal (lane) taps: columns j, j+1, j+2 for j in [0, wo).  Static
    # lane-offset slices keep every later value exactly wo wide, so the final
    # store needs no crop (only a masked tail vst on the last lane group).
    xa = x[:, :, 0:wo]
    xb = x[:, :, 1:wo + 1]
    xc = x[:, :, 2:wo + 2]
    dx = 2.0 * (xa - xc)                             # Gx column term [2, 0, -2]
    sy = 2.0 * xa + 4.0 * xb + 2.0 * xc              # Gy column term [2, 4,  2]
    # Vertical (sublane) combination.
    gx = (dx[:, 0:out_rows] + 2.0 * dx[:, 1:out_rows + 1]
          + dx[:, 2:out_rows + 2])                   # Gx row term [1, 2, 1]
    gy = sy[:, 0:out_rows] - sy[:, 2:out_rows + 2]   # Gy row term [1, 0, -1]
    return jnp.sqrt(gx * gx + gy * gy)


def _sobel_rowtile_kernel(main_ref, halo_ref, out_ref, xs_ref):
    # main_ref: (tb, th, W)   input rows [r*th, r*th + th)
    # halo_ref: (tb, 8, W)    input rows [(r+1)*th, (r+1)*th + 8); only the
    #                         first 2 rows are used (the rest may be OOB
    #                         garbage on the last row tile and is never read).
    # out_ref:  (tb, th, Wo)
    # xs_ref:   (tb, th+8, W) VMEM scratch holding the halo-extended tile so
    #                         the vertical combine reads one contiguous buffer.
    tb, th, w = main_ref.shape
    wo = out_ref.shape[2]
    xs_ref[:, 0:th, :] = main_ref[...]
    xs_ref[:, th:th + _HALO_ROWS, :] = halo_ref[...]
    # TODO(synk): on v7x, an inner 8-row-strip loop over xs_ref would cut the
    # spilled dx/sy intermediates; hidden under HBM bandwidth on v5e/v6e.
    out_ref[...] = _sobel_block(xs_ref[...], th, wo)


def _sobel_image_kernel(img_ref, out_ref):
    # Fallback when Ho has no multiple-of-8 divisor: whole rows per block.
    ho, wo = out_ref.shape[1], out_ref.shape[2]
    out_ref[...] = _sobel_block(img_ref[...], ho, wo)


def _divisors(n):
    return [d for d in range(1, n + 1) if n % d == 0]


def _pick_row_tile(n, ho, row_bytes):
    """Multiple-of-8 divisor of Ho sized to ~_TARGET_BLOCK_BYTES, preferring
    enough row tiles to reach >= _MIN_GRID_STEPS total grid steps."""
    divs = [d for d in _divisors(ho) if d % 8 == 0]
    if not divs:
        return None                        # Ho % 8 != 0 -> whole-image path
    fit = [d for d in divs if d * row_bytes <= _TARGET_BLOCK_BYTES]
    if not fit:
        # TODO(synk): add width tiling for rows wider than the block budget.
        return min(divs)
    pipelined = [d for d in fit if (ho // d) * n >= _MIN_GRID_STEPS]
    return max(pipelined) if pipelined else max(fit)


def _pick_batch_tile(n, block_rows, row_bytes, n_row_tiles):
    cap = max(1, _TARGET_BLOCK_BYTES // max(1, block_rows * row_bytes))
    divs = [d for d in _divisors(n) if d <= cap]
    for min_steps in (_MIN_GRID_STEPS, 2, 1):
        ok = [d for d in divs if (n // d) * n_row_tiles >= min_steps]
        if ok:
            return max(ok)
    return 1


def _vmem_limit_bytes(need_bytes):
    try:
        phys = pltpu.get_tpu_info().vmem_capacity_bytes
    except Exception:
        phys = 64 << 20                    # conservative: v7x has 64 MiB / TC
    limit = max(32 << 20, min(need_bytes, 48 << 20))
    return int(min(limit, max(phys - (8 << 20), 32 << 20)))


def sobel(img):
    """img: (N, 1, H, W) float32 -> (N, 1, H-2, W-2) float32."""
    n, c, h, w = img.shape
    if c != 1:
        raise ValueError("Sobel expects a single input channel")
    if h < 3 or w < 3:
        raise ValueError("Sobel needs H >= 3 and W >= 3 (valid 3x3 conv)")
    ho, wo = h - 2, w - 2

    x = img[:, 0, :, :]                    # (N, H, W); unit-dim squeeze (free)
    row_bytes = w * 4

    cost = pl.CostEstimate(
        flops=14 * n * ho * wo,
        transcendentals=n * ho * wo,
        bytes_accessed=4 * n * (h * w + ho * wo),
    )

    th = _pick_row_tile(n, ho, row_bytes)
    if th is not None:
        # --- halo'd row tiling: grid (N/tb, Ho/th) --------------------------
        nrt = ho // th
        tb = _pick_batch_tile(n, th, row_bytes, nrt)
        nbt = n // tb
        th8 = th // 8                      # main-tile row offset in 8-row blocks

        main_b = tb * th * w * 4
        halo_b = tb * _HALO_ROWS * w * 4
        out_b = tb * th * wo * 4
        xs_b = tb * (th + _HALO_ROWS) * w * 4
        need = 2 * (main_b + halo_b + out_b) + xs_b + 8 * main_b

        out = pl.pallas_call(
            _sobel_rowtile_kernel,
            out_shape=jax.ShapeDtypeStruct((n, ho, wo), jnp.float32),
            grid_spec=pltpu.PrefetchScalarGridSpec(
                num_scalar_prefetch=0,
                grid=(nbt, nrt),
                in_specs=[
                    pl.BlockSpec((tb, th, w), lambda b, r: (b, r, 0)),
                    pl.BlockSpec((tb, _HALO_ROWS, w),
                                 lambda b, r: (b, (r + 1) * th8, 0)),
                ],
                out_specs=pl.BlockSpec((tb, th, wo), lambda b, r: (b, r, 0)),
                scratch_shapes=[
                    pltpu.VMEM((tb, th + _HALO_ROWS, w), jnp.float32)],
            ),
            compiler_params=pltpu.CompilerParams(
                dimension_semantics=("parallel", "parallel"),
                vmem_limit_bytes=_vmem_limit_bytes(need),
            ),
            cost_estimate=cost,
            # NOTE: if DMA is still exposed, sweep pipeline_mode=pl.Buffered(3)
            # on the main input spec.
        )(x, x)
    else:
        # --- whole-image rows per block (Ho % 8 != 0) -----------------------
        tb = _pick_batch_tile(n, h, row_bytes, 1)
        nbt = n // tb
        main_b = tb * h * w * 4
        out_b = tb * ho * wo * 4
        need = 2 * (main_b + out_b) + 8 * main_b

        out = pl.pallas_call(
            _sobel_image_kernel,
            out_shape=jax.ShapeDtypeStruct((n, ho, wo), jnp.float32),
            grid_spec=pltpu.PrefetchScalarGridSpec(
                num_scalar_prefetch=0,
                grid=(nbt,),
                in_specs=[pl.BlockSpec((tb, h, w), lambda i: (i, 0, 0))],
                out_specs=pl.BlockSpec((tb, ho, wo), lambda i: (i, 0, 0)),
            ),
            compiler_params=pltpu.CompilerParams(
                dimension_semantics=("parallel",),
                vmem_limit_bytes=_vmem_limit_bytes(need),
            ),
            cost_estimate=cost,
        )(x)

    # TODO(synk): optional bf16 input/output halves HBM bytes (breaks exact
    # parity with the f32 PyTorch reference, so gate behind a flag).
    return out[:, None, :, :]              # (N, 1, Ho, Wo); unit-dim add (free)


def _sobel_ref(img):
    """Pure-JAX reference mirroring the PyTorch forward."""
    gx = jnp.array([[2.0, 0.0, -2.0],
                    [4.0, 0.0, -4.0],
                    [2.0, 0.0, -2.0]], dtype=jnp.float32)
    gy = jnp.array([[2.0, 4.0, 2.0],
                    [0.0, 0.0, 0.0],
                    [-2.0, -4.0, -2.0]], dtype=jnp.float32)
    wts = jnp.stack([gx, gy], axis=0)[:, None, :, :]      # (2,1,3,3) OIHW
    conv = jax.lax.conv_general_dilated(
        img, wts, window_strides=(1, 1), padding="VALID",
        dimension_numbers=("NCHW", "OIHW", "NCHW"),
        precision=jax.lax.Precision.HIGHEST)
    return jnp.sqrt(jnp.sum(conv * conv, axis=1, keepdims=True))


def _check(shape, key):
    img = jax.random.normal(key, shape, dtype=jnp.float32)
    out = jax.block_until_ready(sobel(img))
    ref = jax.block_until_ready(_sobel_ref(img))
    assert out.shape == ref.shape, (out.shape, ref.shape)
    err = float(jnp.max(jnp.abs(out - ref)))
    assert jnp.allclose(out, ref, atol=1e-4, rtol=1e-4), (shape, err)


if __name__ == "__main__":
    key = jax.random.PRNGKey(0)
    k1, k2, k3 = jax.random.split(key, 3)
    _check((2, 1, 16, 16), k1)    # whole-image path (Ho = 14, not mult of 8)
    _check((1, 1, 66, 128), k2)   # halo'd row tiling: 4 row tiles, edge halo
    _check((2, 1, 10, 8), k3)     # row tiling with a single (th == Ho) tile
    print("KERNEL_OK")
</pallas_src>

<mosaic_0001>
module attributes {stable_mosaic.version = 11 : i64} {
  func.func @_sobel_image_kernel(%arg0: i32, %arg1: memref<1x16x16xf32, #tpu.memory_space<vmem>>, %arg2: memref<1x14x14xf32, #tpu.memory_space<vmem>>) attributes {dimension_semantics = [#tpu.dimension_semantics<parallel>], iteration_bounds = array<i64: 2>, scalar_prefetch = 0 : i64, scratch_operands = 0 : i64, tpu.core_type = #tpu.core_type<tc>, window_params = [{transform_indices = @transform_0, window_bounds = array<i64: 1, 16, 16>}, {transform_indices = @transform_1, window_bounds = array<i64: 1, 14, 14>}]} {
    %c0 = arith.constant 0 : index
    %c0_0 = arith.constant 0 : index
    %c0_1 = arith.constant 0 : index
    %0 = vector.load %arg1[%c0, %c0_0, %c0_1] : memref<1x16x16xf32, #tpu.memory_space<vmem>>, vector<1x16x16xf32>
    %1 = vector.extract_strided_slice %0 {offsets = [0, 0, 0], sizes = [1, 16, 14], strides = [1, 1, 1]} : vector<1x16x16xf32> to vector<1x16x14xf32>
    %2 = vector.extract_strided_slice %0 {offsets = [0, 0, 1], sizes = [1, 16, 14], strides = [1, 1, 1]} : vector<1x16x16xf32> to vector<1x16x14xf32>
    %3 = vector.extract_strided_slice %0 {offsets = [0, 0, 2], sizes = [1, 16, 14], strides = [1, 1, 1]} : vector<1x16x16xf32> to vector<1x16x14xf32>
    %4 = arith.subf %1, %3 : vector<1x16x14xf32>
    %cst = arith.constant 2.000000e+00 : f32
    %5 = vector.broadcast %cst : f32 to vector<1x16x14xf32>
    %6 = arith.mulf %5, %4 : vector<1x16x14xf32>
    %cst_2 = arith.constant 2.000000e+00 : f32
    %7 = vector.broadcast %cst_2 : f32 to vector<1x16x14xf32>
    %8 = arith.mulf %7, %1 : vector<1x16x14xf32>
    %cst_3 = arith.constant 4.000000e+00 : f32
    %9 = vector.broadcast %cst_3 : f32 to vector<1x16x14xf32>
    %10 = arith.mulf %9, %2 : vector<1x16x14xf32>
    %11 = arith.addf %8, %10 : vector<1x16x14xf32>
    %cst_4 = arith.constant 2.000000e+00 : f32
    %12 = vector.broadcast %cst_4 : f32 to vector<1x16x14xf32>
    %13 = arith.mulf %12, %3 : vector<1x16x14xf32>
    %14 = arith.addf %11, %13 : vector<1x16x14xf32>
    %15 = vector.extract_strided_slice %6 {offsets = [0, 0, 0], sizes = [1, 14, 14], strides = [1, 1, 1]} : vector<1x16x14xf32> to vector<1x14x14xf32>
    %16 = vector.extract_strided_slice %6 {offsets = [0, 1, 0], sizes = [1, 14, 14], strides = [1, 1, 1]} : vector<1x16x14xf32> to vector<1x14x14xf32>
    %cst_5 = arith.constant 2.000000e+00 : f32
    %17 = vector.broadcast %cst_5 : f32 to vector<1x14x14xf32>
    %18 = arith.mulf %17, %16 : vector<1x14x14xf32>
    %19 = arith.addf %15, %18 : vector<1x14x14xf32>
    %20 = vector.extract_strided_slice %6 {offsets = [0, 2, 0], sizes = [1, 14, 14], strides = [1, 1, 1]} : vector<1x16x14xf32> to vector<1x14x14xf32>
    %21 = arith.addf %19, %20 : vector<1x14x14xf32>
    %22 = vector.extract_strided_slice %14 {offsets = [0, 0, 0], sizes = [1, 14, 14], strides = [1, 1, 1]} : vector<1x16x14xf32> to vector<1x14x14xf32>
    %23 = vector.extract_strided_slice %14 {offsets = [0, 2, 0], sizes = [1, 14, 14], strides = [1, 1, 1]} : vector<1x16x14xf32> to vector<1x14x14xf32>
    %24 = arith.subf %22, %23 : vector<1x14x14xf32>
    %25 = arith.mulf %21, %21 : vector<1x14x14xf32>
    %26 = arith.mulf %24, %24 : vector<1x14x14xf32>
    %27 = arith.addf %25, %26 : vector<1x14x14xf32>
    %28 = math.sqrt %27 : vector<1x14x14xf32>
    %c0_6 = arith.constant 0 : index
    %c0_7 = arith.constant 0 : index
    %c0_8 = arith.constant 0 : index
    %29 = vector.load %arg2[%c0_6, %c0_7, %c0_8] : memref<1x14x14xf32, #tpu.memory_space<vmem>>, vector<1x14x14xf32>
    tpu.vector_store %arg2[%c0_6, %c0_7, %c0_8], %28 {strides = array<i32>} : memref<1x14x14xf32, #tpu.memory_space<vmem>>, vector<1x14x14xf32>,
    return
  }
  func.func @transform_0(%arg0: i32) -> (i32, i32, i32) {
    %c0_i32 = arith.constant 0 : i32
    %c0_i32_0 = arith.constant 0 : i32
    %c0_i32_1 = arith.constant 0 : i32
    return %arg0, %c0_i32, %c0_i32_0 : i32, i32, i32
  }
  func.func @transform_1(%arg0: i32) -> (i32, i32, i32) {
    %c0_i32 = arith.constant 0 : i32
    %c0_i32_0 = arith.constant 0 : i32
    %c0_i32_1 = arith.constant 0 : i32
    return %arg0, %c0_i32, %c0_i32_0 : i32, i32, i32
  }
}

</mosaic_0001>

<bundles_post_ra>
// kernel: tpu_custom_call.1
= control target key start
LH: loop header
LB: loop body
LE: loop exit
PB: predicated region body
PF: predicated region fallthrough
CT: control target
= control target key end

     0   :  { %6 = vsyncpa [#allocation3], 0  ;;  %s543_s0 = inlined_call_operand.hbm [shape: f32[2,16,16], index: 0, kind: input, shape index: {}]   ;;  %s544_s1 = inlined_call_operand.vmem [shape: f32[2,14,14], index: 1, kind: output, shape index: {}]  }
   0x1   :  { %8 = vsyncpa [#allocation3 + $0x1], 0  ;;  %s450_s6 = smov 0   ;;  %s452_s7 = smov 0  }
   0x2   :  { %s454_s8 = smov 0   ;;  %s456_s9 = smov 0  }
   0x3 LB: > { %s469_s10 = sadd.s32 4294967295, %s434_s9   ;;  %s472_s11 = sadd.s32 1, %s434_s9   ;;  %s434_s9 = sphi %s456_s9, %s551_s9   ;;  %s430_s8 = sphi %s454_s8, %s550_s8   ;;  %s426_s7 = sphi %s452_s7, %s549_s7   ;;  %s422_s6 = sphi %s450_s6, %s548_s6  }
   0x4   : > { %s18_s12 = ssub.s32 %s434_s9, %s472_s11  ;;  %s21_s13 = sadd.s32 1, %s430_s8 }
   0x5   : > { %p19_p0 = scmp.eq.s32.totalorder %s18_s12, 0  ;;  %p28_p1 = scmp.ne.s32.totalorder %s430_s8, %s426_s7 }
   0x6   : > { %p29_p2 = scmp.eq.s32.totalorder %s434_s9, 0  ;;  %p34_p3 = scmp.ne.s32.totalorder %s426_s7, %s422_s6 }
   0x7   : > { %s482_s14 = scalar_select %p19_p0, %s430_s8, %s21_s13  }
   0x8   : > { %p484_p4 = por %p29_p2, %p28_p1  ;;  %p35_p5 = scmp.eq.s32.totalorder %s469_s10, 0 }
   0x9   : > { %p329_p6 = scmp.lt.s32.totalorder %s434_s9, 2  ;;  %s84_s17 = sand.u32 1, %s430_s8  }
   0xa   : > { %p490_p7 = por %p35_p5, %p34_p3  ;;  %s312_s18 = sshll.u32 %s84_s17, 4 }
   0xb   : > { %s321_s19 = sshll.u32 %s434_s9, 4  ;;  %s88_s23 = scalar_lea.vmem [#allocation2], %s312_s18 }
   0xc   : > { %s93_s22 = scalar_lea.hbm %s543_s0, %s321_s19  ;;  %s96_s24 = sshll.u32 %s88_s23, 4  ;;  %s97_s24 = int_to_ptr.vmem [resolvable:$true] %s96_s24 }
   0xd   : > { %s94_s25 = sshll.u32 %s93_s22, 4  ;;  %p501_p8 = pnand %p329_p6, %p484_p4  ;;  %s95_s25 = int_to_ptr.hbm [resolvable:$true] %s94_s25 }
   0xe   : > { %p315_p9 = scmp.ge.s32.totalorder %s434_s9, 1  ;;  %s85_s27 = scalar_lea.sflag [#allocation3], %s84_s17 }
   0xf   : > { %s370_s28 = sshra.s32 %s95_s25, 4  ;;  %p374_p11 = pneg %p501_p8  ;;  %s371_s28 = int_to_ptr.hbm [resolvable:$true] %s370_s28 }
  0x10   : > { %s372_s29 = scalar_lea.hbm %s371_s28, 16  ;;  %s377_s3 = scalar_lea.hbm %s543_s0, 32 }
  0x11   : > { %p373_p10 = scmp.ne.s32.totalorder %s371_s28, %s372_s29  ;;  %p378_p0 = scmp.lt.s32.totalorder %s371_s28, %s543_s0 }
  0x12   : > { %p379_p1 = scmp.lt.s32.totalorder %s377_s3, %s372_s29 }
  0x13   : > { %p375_p12 = pnand %p374_p11, %p373_p10 }
  0x14   : > { %p380_p2 = por %p379_p1, %p378_p0 }
  0x15   : > { %p376_p13 = pneg %p375_p12 }
  0x17   : > { %p381_p3 = pnand %p380_p2, %p376_p13 }
  0x19   : > { %384 = shalt.err (!%p381_p3)
}
  0x1a   : > { %s436_s6 = smov 128   ;;  %s437_s12 = smov 8  }
  0x1b   : > { %328 = dma.hbm_to_vmem [thread:$0]  (!%p501_p8), %s95_s25, 256, %s97_s24, %s85_s27, %s436_s6, %s436_s6, %s437_s12  }
  0x1c   : > { %p104_p4 = scmp.lt.s32.totalorder %s434_s9, 3 }
  0x1e   : > { %p105_p5 = pnand %p315_p9, %p104_p4 }
  0x1f   : > { %s110_s13 = sand.u32 (!%p105_p5), 1, %s426_s7  }
  0x20   : > { %108 = sbr.rel (%p105_p5) target bundleno = 201 (0xc9), region = 24  ;;  %s316_s15 = sshll.u32 (!%p105_p5), %s110_s13, 4 }
  0x21   : > { %s111_s17 = scalar_lea.sflag (!%p105_p5), [#allocation3], %s110_s13  ;;  %s114_s18 = scalar_lea.vmem (!%p105_p5), [#allocation2], %s316_s15 }
  0x25   : > { %417 = dma.done.wait (%p490_p7), %s111_s17, 256  }
  0x26   : > { %419 = vsyncadd (%p490_p7), %s111_s17, 4294967040  ;;  %v139_v0 = vld [vmem:[%s114_s18] sm:$0xff]  ;;  %s438_s19 = smov 126   ;;  %s439_s20 = smov 127   ;;  %v140_v3 = vld [vmem:[%s114_s18 + $0x8] sm:$0xff]  ;;  %vm181_vm0 = vcmask 1046528  }
  0x27   : > { %143 = vrot.lane.b32.xlu0 %v139_v0, %s438_s19  ;;  %v155_v1 = vmul.f32 4.0, %v139_v0  ;;  %v153_v2 = vmul.f32 2.0, %v139_v0  ;;  %v156_v4 = vmul.f32 4.0, %v140_v3  ;;  %v154_v5 = vmul.f32 2.0, %v140_v3  ;;  %p134_p6 = scmp.lt.s32.totalorder %s469_s10, 1 }
  0x28   : > { %vm191_vm1 = vcmask 1045504   ;;  %vm238_vm2 = vcmask 113664   ;;  %vm240_vm3 = vcmask 111616  }
  0x29   : > { %159 = vrot.lane.b32.xlu1 %v155_v1, %s439_s20  ;;  %169 = vrot.lane.b32.xlu2 %v153_v2, %s438_s19  ;;  %s553_s10 = smov (!%p134_p6, %s469_s10), 1 }
  0x2a   : > { %s322_s9 = sshll.u32 %s553_s10, 4 }
  0x2b   : > { %s138_s22 = scalar_lea.vmem %s544_s1, %s322_s9 }
  0x2f   : > { %145 = vrot.lane.b32.xlu0 %v140_v3, %s438_s19 }
  0x31   : > { %161 = vrot.lane.b32.xlu1 %v156_v4, %s439_s20  ;;  %171 = vrot.lane.b32.xlu2 %v154_v5, %s438_s19 }
  0x83   : > { %v170_v7 = vpop.permute.xlu2 %169 }
  0x8b   : > { %v172_v16 = vpop.permute.xlu2 %171 }
  0x99   : > { %v144_v6 = vpop.permute.xlu0 %143 }
  0x9a   : > { %v149_v8 = vsub.f32 %v139_v0, %v144_v6 }
  0x9b   : > { %v160_v9 = vpop.permute.xlu1 %159 }
  0x9c   : > { %v151_v10 = vmul.f32 2.0, %v149_v8  ;;  %v165_v11 = vadd.f32 %v160_v9, %v153_v2 }
  0x9e   : > { %v177_v14 = vmul.f32 2.0, %v151_v10  ;;  %v175_v17 = vadd.f32 %v170_v7, %v165_v11  ;;  %v192_v27 = vrot.slane %v151_v10, 2 }
  0xa0   : > { %v182_v22 = vrot.slane %v177_v14, 1  ;;  %v201_v23 = vrot.slane %v175_v17, 2 }
  0xa1   : > { %v146_v12 = vpop.permute.xlu0 %145 }
  0xa2   : > { %v150_v13 = vsub.f32 %v140_v3, %v146_v12 }
  0xa3   : > { %v162_v15 = vpop.permute.xlu1 %161 }
  0xa4   : > { %v152_v18 = vmul.f32 2.0, %v150_v13  ;;  %v166_v19 = vadd.f32 %v162_v15, %v154_v5 }
  0xa6   : > { %v178_v20 = vmul.f32 2.0, %v152_v18  ;;  %v176_v21 = vadd.f32 %v172_v16, %v166_v19  ;;  %v193_v25 = vrot.slane %v152_v18, 2 }
  0xa8   : > { %v183_v24 = vrot.slane %v178_v20, 1  ;;  %v202_v26 = vrot.slane %v176_v21, 2  ;;  %v194_v34 = vsel %vm191_vm1, %v192_v27, %v193_v25 }
  0xaa   : > { %v184_v28 = vsel %vm181_vm0, %v182_v22, %v183_v24  ;;  %v188_v29 = vadd.f32 %v183_v24, %v152_v18  ;;  %v203_v30 = vsel %vm191_vm1, %v201_v23, %v202_v26  ;;  %v207_v31 = vsub.f32 %v176_v21, %v202_v26 }
  0xab   : > { %v187_v32 = vadd.f32 %v184_v28, %v151_v10  ;;  %v206_v33 = vsub.f32 %v175_v17, %v203_v30 }
  0xac   : > { %v198_v35 = vadd.f32 %v193_v25, %v188_v29  ;;  %v211_v38 = vmul.f32 %v207_v31, %v207_v31 }
  0xad   : > { %v197_v36 = vadd.f32 %v194_v34, %v187_v32  ;;  %v210_v40 = vmul.f32 %v206_v33, %v206_v33 }
  0xae   : > { %v209_v37 = vmul.f32 %v198_v35, %v198_v35 }
  0xaf   : > { %v208_v39 = vmul.f32 %v197_v36, %v197_v36 }
  0xb0   : > { %v213_v41 = vadd.f32 %v211_v38, %v209_v37 }
  0xb1   : > { %v212_v42 = vadd.f32 %v210_v40, %v208_v39 }
  0xb2   : > { %366 = vrsqrt.f32 %v213_v41  ;;  %vm233_vm4 = vcmp.eq.f32.partialorder %v213_v41, inf  ;;  %v236_v57 = vand.u32 2147483648, %v213_v41  ;;  %vm235_vm6 = vcmp.eq.f32.partialorder %v213_v41, 0.0 }
  0xb3   : > { %368 = vrsqrt.f32 %v212_v42  ;;  %vm221_vm5 = vcmp.eq.f32.partialorder %v212_v42, inf  ;;  %v224_v58 = vand.u32 2147483648, %v212_v42  ;;  %vm223_vm7 = vcmp.eq.f32.partialorder %v212_v42, 0.0 }
  0xb8   : > { %v367_v43 = vpop.eup %366 }
  0xb9   : > { %v369_v44 = vpop.eup %368  ;;  %v227_v45 = vmul.f32 %v367_v43, %v213_v41 }
  0xba   : > { %v215_v46 = vmul.f32 %v369_v44, %v212_v42 }
  0xbb   : > { %v228_v47 = vmul.f32 %v367_v43, %v227_v45 }
  0xbc   : > { %v216_v48 = vmul.f32 %v369_v44, %v215_v46 }
  0xbd   : > { %v229_v49 = vmul.f32 0.5, %v228_v47 }
  0xbe   : > { %v217_v50 = vmul.f32 0.5, %v216_v48 }
  0xbf   : > { %v230_v51 = vsub.f32 1.5, %v229_v49 }
  0xc0   : > { %v218_v52 = vsub.f32 1.5, %v217_v50 }
  0xc1   : > { %v231_v53 = vmul.f32 %v367_v43, %v230_v51 }
  0xc2   : > { %v219_v54 = vmul.f32 %v369_v44, %v218_v52 }
  0xc3   : > { %v232_v55 = vmul.f32 %v231_v53, %v213_v41 }
  0xc4   : > { %v220_v56 = vmul.f32 %v219_v54, %v212_v42 }
  0xc5   : > { %v234_v59 = vsel %vm233_vm4, %v213_v41, %v232_v55 }
  0xc6   : > { %v222_v60 = vsel %vm221_vm5, %v212_v42, %v220_v56  ;;  %v237_v61 = vsel %vm235_vm6, %v236_v57, %v234_v59 }
  0xc7   : > { %v225_v62 = vsel %vm223_vm7, %v224_v58, %v222_v60  ;;  %241 = vst.msk [vmem:[%s138_s22 + $0x8] sm:$0x3f] %vm240_vm3, %v237_v61 }
  0xc8   : > { %239 = vst.msk [vmem:[%s138_s22] sm:$0xff] %vm238_vm2, %v225_v62 }
  0xc9 PF: > { %p11_p7 = scmp.ge.s32.totalorder %s472_s11, 4   ;;  %s548_s6 = smov %s426_s7 }
  0xca   : > { %s549_s7 = smov %s430_s8  ;;  %s550_s8 = smov %s482_s14 }
  0xcb   : > { %s551_s9 = smov %s472_s11  ;;  %13 = sbr.rel (!%p11_p7) target bundleno = 3 (0x3), region = 64 }
  0xd0   :  { %263 = vsyncpa [#allocation3], 1 }
  0xd1   :  { %265 = vsyncpa [#allocation3 + $0x1], 1 }

</bundles_post_ra>
